<compile_context>
chip_gen: v7x
topology: tpu7x:2x2x1
jax: 0.10.0
libtpu: 0.0.40
codegen_flags: <defaults>
</compile_context>

<pallas_src>
import functools

import jax
import jax.numpy as jnp
from jax.experimental import pallas as pl
from jax.experimental.pallas import tpu as pltpu


# ------------------------------- helpers ------------------------------------


def _round_up(x, m):
    return (x + m - 1) // m * m


def _choose_row_tile(n, bytes_per_row, vmem_budget=24 << 20):
    """Largest multiple-of-8 row tile whose working set fits the VMEM budget,
    capped at 2048 rows.  Small N gets a single tile (no forced split: v5e/v6e
    have one TensorCore, so extra grid steps are serial overhead)."""
    cap = (vmem_budget // max(bytes_per_row, 1)) // 8 * 8
    cap = max(8, min(2048, cap))
    if n >= cap:
        return cap
    return _round_up(n, 8)


# ----------------------------- Pallas kernel --------------------------------


def _fused_mlp_kernel(x_ref, *refs, num_gcns, num_layers, dh_p):
    """One row-tile of x through every branch and every layer.

    x_ref : [tn, Din_p]           activation row tile (f32, zero-padded lanes)
    refs  : w0c [Din_p, G*Dh_p], b0c [1, G*Dh_p],
            (w_l [G, Dh_p, Dh_p], b_l [G, Dh_p]) for each middle layer,
            w_last [G, Dh_p, Dout_p], b_last [G, Dout_p],
            o_ref [G, tn, Dout_p]  (bf16, lane-dense stores)
    All weights are BN-folded (eval mode) and resident in VMEM.
    """
    o_ref = refs[-1]
    wb = refs[:-1]
    w0_ref, b0_ref = wb[0], wb[1]
    cdt = w0_ref.dtype  # bf16 compute dtype

    # ---- layer 0: one matmul for all branches (N = G*Dh_p >= 256 wide) ----
    x = x_ref[...].astype(cdt)                           # cast x once
    z = jnp.dot(x, w0_ref[...], preferred_element_type=jnp.float32)
    z = z + b0_ref[...]                                  # f32 bias (BN folded)
    # ReLU in f32, then carry activations in bf16 between layers.
    # Dropout is identity in eval mode.
    h_all = jnp.maximum(z, 0.0).astype(cdt)              # [tn, G*Dh_p]

    idx = 2
    mids = []
    for _ in range(num_layers - 2):                      # static, fully unrolled
        mids.append((wb[idx], wb[idx + 1]))
        idx += 2
    wl_ref, bl_ref = wb[idx], wb[idx + 1]

    for g in range(num_gcns):                            # static loop over branches
        h = h_all[:, g * dh_p:(g + 1) * dh_p]            # lane-aligned static slice
        for wm_ref, bm_ref in mids:
            z = jnp.dot(h, wm_ref[g], preferred_element_type=jnp.float32)
            z = z + bm_ref[g]
            h = jnp.maximum(z, 0.0).astype(cdt)
        z = jnp.dot(h, wl_ref[g], preferred_element_type=jnp.float32)
        z = z + bl_ref[g]
        o_ref[g, :, :] = z.astype(o_ref.dtype)           # bf16 writeback


@jax.jit
def fused_mlp(x, *wb):
    """x: [N, Cin] f32, wb: packed per-layer weight/bias stacks (see
    prepare_fused_params) -> [G, N_pad, Dout_p] padded bf16 outputs."""
    out_dtype = jnp.bfloat16
    n, cin = x.shape
    w0c = wb[0]
    w_last = wb[-2]
    num_gcns, dh_p, dout_p = w_last.shape
    din_p = w0c.shape[0]
    num_layers = len(wb) // 2

    itemsize_out = jnp.dtype(out_dtype).itemsize
    bytes_per_row = (din_p * 4 * 2                         # f32 x tile, 2 buffers
                     + num_gcns * dout_p * itemsize_out * 2  # out tile, 2 buffers
                     + num_gcns * dh_p * 6)                 # bf16 h + f32 z temps
    tn = _choose_row_tile(n, bytes_per_row)
    n_pad = _round_up(n, tn)

    x_pad = jnp.zeros((n_pad, din_p), jnp.float32).at[:n, :cin].set(
        x.astype(jnp.float32))

    # Explicit VMEM budget: (double-buffered) resident weights + tiles + headroom.
    weight_bytes = 2 * sum(int(a.size) * a.dtype.itemsize for a in wb)
    needed = weight_bytes + tn * bytes_per_row + (8 << 20)
    vmem_limit = int(min(max(needed, 32 << 20), 100 << 20))

    kernel = functools.partial(_fused_mlp_kernel, num_gcns=num_gcns,
                               num_layers=num_layers, dh_p=dh_p)

    in_specs = [pl.BlockSpec((tn, din_p), lambda i: (i, 0))]
    for a in wb:  # full-extent, constant-index -> resident in VMEM
        in_specs.append(pl.BlockSpec(a.shape, lambda i, _nd=a.ndim: (0,) * _nd))

    return pl.pallas_call(
        kernel,
        out_shape=jax.ShapeDtypeStruct((num_gcns, n_pad, dout_p), out_dtype),
        grid_spec=pl.GridSpec(
            grid=(n_pad // tn,),
            in_specs=in_specs,
            out_specs=pl.BlockSpec((num_gcns, tn, dout_p), lambda i: (0, i, 0)),
        ),
        compiler_params=pltpu.CompilerParams(
            dimension_semantics=("parallel",),
            vmem_limit_bytes=vmem_limit),
    )(x_pad, *wb)


# ---------------------------- parameter setup -------------------------------


def init_params(key, in_channels, hidden_channels, out_channels, num_layers,
                num_gcns, dtype=jnp.float32):
    """Deterministic synthetic params mirroring the PyTorch module's shapes."""
    params = []
    for _ in range(num_gcns):
        gcn = {"lins": [], "bns": []}
        dims = ([in_channels] + [hidden_channels] * (num_layers - 1)
                + [out_channels])
        for li in range(num_layers):
            cin, cout = dims[li], dims[li + 1]
            key, kw, kb = jax.random.split(key, 3)
            # Linear stored as [Cin, Cout] (transpose of torch's [out, in]).
            w = jax.random.normal(kw, (cin, cout), dtype) * 0.1
            b = jax.random.normal(kb, (1, cout), dtype) * 0.1
            gcn["lins"].append((w, b))
            if li < num_layers - 1:
                key, kg, kbt, km, kv = jax.random.split(key, 5)
                gamma = 1.0 + 0.1 * jax.random.normal(kg, (1, cout), dtype)
                beta = 0.1 * jax.random.normal(kbt, (1, cout), dtype)
                rmean = 0.1 * jax.random.normal(km, (1, cout), dtype)
                rvar = 1.0 + 0.1 * jax.random.uniform(kv, (1, cout), dtype)
                gcn["bns"].append((gamma, beta, rmean, rvar))
        params.append(gcn)
    return params


def prepare_fused_params(params, eps=1e-5, weight_dtype=jnp.bfloat16):
    """One-time setup (hoisted out of the forward path): fold eval-mode BatchNorm
    into the Linear layers and pack per-layer, per-branch lane-padded stacks.

    Returns (wb, meta) where wb = (w0c, b0c, [w_l, b_l ...], w_last, b_last)."""
    num_gcns = len(params)
    num_layers = len(params[0]["lins"])
    in_channels = params[0]["lins"][0][0].shape[0]
    hidden = params[0]["lins"][0][0].shape[1]
    out_channels = params[0]["lins"][-1][0].shape[1]

    din_p = _round_up(in_channels, 128)
    dh_p = _round_up(hidden, 128)
    dout_p = _round_up(out_channels, 128)

    def fold(g, l):
        w, b = params[g]["lins"][l]
        w = w.astype(jnp.float32)
        b = b.astype(jnp.float32).reshape(-1)
        if l < num_layers - 1:
            gamma, beta, rmean, rvar = [t.astype(jnp.float32).reshape(-1)
                                        for t in params[g]["bns"][l]]
            scale = gamma / jnp.sqrt(rvar + eps)
            w = w * scale[None, :]
            b = b * scale + (beta - rmean * scale)
        return w, b

    wb = []
    # Layer 0: branch-concatenated weights -> single wide MXU matmul in-kernel.
    w0c = jnp.zeros((din_p, num_gcns * dh_p), jnp.float32)
    b0c = jnp.zeros((1, num_gcns * dh_p), jnp.float32)
    for g in range(num_gcns):
        w, b = fold(g, 0)
        w0c = w0c.at[:in_channels, g * dh_p:g * dh_p + hidden].set(w)
        b0c = b0c.at[0, g * dh_p:g * dh_p + hidden].set(b)
    wb += [w0c.astype(weight_dtype), b0c]

    # Middle layers.
    for l in range(1, num_layers - 1):
        wl = jnp.zeros((num_gcns, dh_p, dh_p), jnp.float32)
        bl = jnp.zeros((num_gcns, dh_p), jnp.float32)
        for g in range(num_gcns):
            w, b = fold(g, l)
            wl = wl.at[g, :hidden, :hidden].set(w)
            bl = bl.at[g, :hidden].set(b)
        wb += [wl.astype(weight_dtype), bl]

    # Last (logits) layer.
    wl = jnp.zeros((num_gcns, dh_p, dout_p), jnp.float32)
    bl = jnp.zeros((num_gcns, dout_p), jnp.float32)
    for g in range(num_gcns):
        w, b = fold(g, num_layers - 1)
        wl = wl.at[g, :hidden, :out_channels].set(w)
        bl = bl.at[g, :out_channels].set(b)
    wb += [wl.astype(weight_dtype), bl]

    meta = dict(num_gcns=num_gcns, num_layers=num_layers,
                in_channels=in_channels, hidden=hidden,
                out_channels=out_channels)
    return tuple(wb), meta


def mlp_forward(wb, meta, x):
    """Eval-mode forward: list of per-branch logits [N, out_channels] (bf16),
    same structure as the torch module's forward()."""
    out = fused_mlp(x, *wb)
    n = x.shape[0]
    oc = meta["out_channels"]
    return [out[g, :n, :oc] for g in range(meta["num_gcns"])]


# ------------------------------ references ----------------------------------


def mlp_forward_ref_f32(params, x, eps=1e-5):
    """Pure-jnp f32 reference (exact eval-mode semantics)."""
    y_hats = []
    for gcn in params:
        h = x
        n_layers = len(gcn["lins"])
        for li in range(n_layers - 1):
            w, b = gcn["lins"][li]
            gamma, beta, rmean, rvar = gcn["bns"][li]
            z = h @ w + b
            z = (z - rmean) / jnp.sqrt(rvar + eps) * gamma + beta
            h = jnp.maximum(z, 0.0)
        w, b = gcn["lins"][-1]
        y_hats.append(h @ w + b)
    return y_hats


def mlp_forward_ref_bf16(params, x, eps=1e-5):
    """Reference mirroring the kernel numerics (BN fold, bf16 operands/activations,
    f32 accumulation, bf16 output) for a tight correctness check."""
    y_hats = []
    n_layers = len(params[0]["lins"])
    for gcn in params:
        h = x.astype(jnp.bfloat16)
        for li in range(n_layers):
            w, b = gcn["lins"][li]
            w = w.astype(jnp.float32)
            b = b.astype(jnp.float32)
            if li < n_layers - 1:
                gamma, beta, rmean, rvar = gcn["bns"][li]
                scale = gamma / jnp.sqrt(rvar + eps)
                w = w * scale
                b = b * scale + (beta - rmean * scale)
            z = jnp.dot(h, w.astype(jnp.bfloat16),
                        preferred_element_type=jnp.float32) + b
            if li < n_layers - 1:
                h = jnp.maximum(z, 0.0).astype(jnp.bfloat16)
            else:
                h = z
        y_hats.append(h.astype(jnp.bfloat16))
    return y_hats


# ---------------------------------- main -------------------------------------


if __name__ == "__main__":
    in_channels = 16
    hidden_channels = 32
    out_channels = 8
    num_layers = 3
    num_gcns = 2
    num_nodes = 64

    key = jax.random.PRNGKey(0)
    key, kx = jax.random.split(key)
    x = jax.random.normal(kx, (num_nodes, in_channels), jnp.float32)
    # edge_index / edge_attr are unused by the torch forward; kept for parity.
    edge_index = jnp.zeros((2, 1), jnp.int32)
    edge_attr = jnp.zeros((1, 1), jnp.float32)

    params = init_params(key, in_channels, hidden_channels, out_channels,
                         num_layers, num_gcns)

    # One-time BN fold + packing (hoisted out of the per-call path).
    wb, meta = prepare_fused_params(params)

    outs = mlp_forward(wb, meta, x)
    outs = [jax.block_until_ready(o) for o in outs]

    refs_bf16 = mlp_forward_ref_bf16(params, x)
    refs_f32 = mlp_forward_ref_f32(params, x)
    for o, rbf, r32 in zip(outs, refs_bf16, refs_f32):
        assert o.shape == (num_nodes, out_channels)
        o32 = o.astype(jnp.float32)
        # Tight check vs a reference using identical numerics.
        assert jnp.allclose(o32, rbf.astype(jnp.float32), atol=1e-2, rtol=1e-2)
        # Loose check vs the pure-f32 eval-mode reference (bf16 tolerance).
        assert jnp.allclose(o32, r32, atol=5e-2, rtol=5e-2)

    print("KERNEL_OK")
</pallas_src>

<mosaic_0001>
module attributes {stable_mosaic.version = 11 : i64} {
  func.func @_fused_mlp_kernel(%arg0: i32, %arg1: memref<64x128xf32, #tpu.memory_space<vmem>>, %arg2: memref<128x256xbf16, #tpu.memory_space<vmem>>, %arg3: memref<1x256xf32, #tpu.memory_space<vmem>>, %arg4: memref<2x128x128xbf16, #tpu.memory_space<vmem>>, %arg5: memref<2x128xf32, #tpu.memory_space<vmem>>, %arg6: memref<2x128x128xbf16, #tpu.memory_space<vmem>>, %arg7: memref<2x128xf32, #tpu.memory_space<vmem>>, %arg8: memref<2x64x128xbf16, #tpu.memory_space<vmem>>) attributes {dimension_semantics = [#tpu.dimension_semantics<parallel>], iteration_bounds = array<i64: 1>, scalar_prefetch = 0 : i64, scratch_operands = 0 : i64, tpu.core_type = #tpu.core_type<tc>, window_params = [{transform_indices = @transform_0, window_bounds = array<i64: 64, 128>}, {pipeline_mode = #tpu.pipeline_mode<synchronous>, transform_indices = @transform_1, window_bounds = array<i64: 128, 256>}, {pipeline_mode = #tpu.pipeline_mode<synchronous>, transform_indices = @transform_2, window_bounds = array<i64: 1, 256>}, {pipeline_mode = #tpu.pipeline_mode<synchronous>, transform_indices = @transform_3, window_bounds = array<i64: 2, 128, 128>}, {pipeline_mode = #tpu.pipeline_mode<synchronous>, transform_indices = @transform_4, window_bounds = array<i64: 2, 128>}, {pipeline_mode = #tpu.pipeline_mode<synchronous>, transform_indices = @transform_5, window_bounds = array<i64: 2, 128, 128>}, {pipeline_mode = #tpu.pipeline_mode<synchronous>, transform_indices = @transform_6, window_bounds = array<i64: 2, 128>}, {transform_indices = @transform_7, window_bounds = array<i64: 2, 64, 128>}]} {
    %c0 = arith.constant 0 : index
    %c0_0 = arith.constant 0 : index
    %0 = vector.load %arg1[%c0, %c0_0] : memref<64x128xf32, #tpu.memory_space<vmem>>, vector<64x128xf32>
    %1 = arith.truncf %0 : vector<64x128xf32> to vector<64x128xbf16>
    %c0_1 = arith.constant 0 : index
    %c0_2 = arith.constant 0 : index
    %2 = vector.load %arg2[%c0_1, %c0_2] : memref<128x256xbf16, #tpu.memory_space<vmem>>, vector<128x256xbf16>
    %cst = arith.constant dense<0.000000e+00> : vector<64x256xf32>
    %3 = tpu.matmul %1, %2, %cst {dimension_numbers = #tpu.dot_dimension_numbers<[1], [0], [0], [1], [0, 0, 1, 1], [], []>} : vector<64x128xbf16>, vector<128x256xbf16>, vector<64x256xf32> -> vector<64x256xf32>
    %c0_3 = arith.constant 0 : index
    %c0_4 = arith.constant 0 : index
    %4 = vector.load %arg3[%c0_3, %c0_4] : memref<1x256xf32, #tpu.memory_space<vmem>>, vector<1x256xf32>
    %5 = vector.broadcast %4 : vector<1x256xf32> to vector<64x256xf32>
    %6 = arith.addf %3, %5 : vector<64x256xf32>
    %cst_5 = arith.constant 0.000000e+00 : f32
    %7 = vector.broadcast %cst_5 : f32 to vector<64x256xf32>
    %8 = arith.maximumf %6, %7 : vector<64x256xf32>
    %9 = arith.truncf %8 : vector<64x256xf32> to vector<64x256xbf16>
    %10 = vector.extract_strided_slice %9 {offsets = [0, 0], sizes = [64, 128], strides = [1, 1]} : vector<64x256xbf16> to vector<64x128xbf16>
    %c0_6 = arith.constant 0 : index
    %c0_7 = arith.constant 0 : index
    %c0_8 = arith.constant 0 : index
    %11 = vector.load %arg4[%c0_6, %c0_7, %c0_8] : memref<2x128x128xbf16, #tpu.memory_space<vmem>>, vector<1x128x128xbf16>
    %12 = vector.shape_cast %11 : vector<1x128x128xbf16> to vector<128x128xbf16>
    %cst_9 = arith.constant dense<0.000000e+00> : vector<64x128xf32>
    %13 = tpu.matmul %10, %12, %cst_9 {dimension_numbers = #tpu.dot_dimension_numbers<[1], [0], [0], [1], [0, 0, 1, 1], [], []>} : vector<64x128xbf16>, vector<128x128xbf16>, vector<64x128xf32> -> vector<64x128xf32>
    %c0_10 = arith.constant 0 : index
    %c0_11 = arith.constant 0 : index
    %14 = vector.load %arg5[%c0_10, %c0_11] : memref<2x128xf32, #tpu.memory_space<vmem>>, vector<1x128xf32>
    %15 = vector.shape_cast %14 : vector<1x128xf32> to vector<128xf32>
    %16 = vector.shape_cast %15 : vector<128xf32> to vector<1x128xf32>
    %17 = vector.broadcast %16 : vector<1x128xf32> to vector<64x128xf32>
    %18 = arith.addf %13, %17 : vector<64x128xf32>
    %cst_12 = arith.constant 0.000000e+00 : f32
    %19 = vector.broadcast %cst_12 : f32 to vector<64x128xf32>
    %20 = arith.maximumf %18, %19 : vector<64x128xf32>
    %21 = arith.truncf %20 : vector<64x128xf32> to vector<64x128xbf16>
    %c0_13 = arith.constant 0 : index
    %c0_14 = arith.constant 0 : index
    %c0_15 = arith.constant 0 : index
    %22 = vector.load %arg6[%c0_13, %c0_14, %c0_15] : memref<2x128x128xbf16, #tpu.memory_space<vmem>>, vector<1x128x128xbf16>
    %23 = vector.shape_cast %22 : vector<1x128x128xbf16> to vector<128x128xbf16>
    %cst_16 = arith.constant dense<0.000000e+00> : vector<64x128xf32>
    %24 = tpu.matmul %21, %23, %cst_16 {dimension_numbers = #tpu.dot_dimension_numbers<[1], [0], [0], [1], [0, 0, 1, 1], [], []>} : vector<64x128xbf16>, vector<128x128xbf16>, vector<64x128xf32> -> vector<64x128xf32>
    %c0_17 = arith.constant 0 : index
    %c0_18 = arith.constant 0 : index
    %25 = vector.load %arg7[%c0_17, %c0_18] : memref<2x128xf32, #tpu.memory_space<vmem>>, vector<1x128xf32>
    %26 = vector.shape_cast %25 : vector<1x128xf32> to vector<128xf32>
    %27 = vector.shape_cast %26 : vector<128xf32> to vector<1x128xf32>
    %28 = vector.broadcast %27 : vector<1x128xf32> to vector<64x128xf32>
    %29 = arith.addf %24, %28 : vector<64x128xf32>
    %30 = arith.truncf %29 : vector<64x128xf32> to vector<64x128xbf16>
    %c0_19 = arith.constant 0 : index
    %c0_20 = arith.constant 0 : index
    %c0_21 = arith.constant 0 : index
    %31 = vector.load %arg8[%c0_19, %c0_20, %c0_21] : memref<2x64x128xbf16, #tpu.memory_space<vmem>>, vector<1x64x128xbf16>
    %32 = vector.shape_cast %31 : vector<1x64x128xbf16> to vector<64x128xbf16>
    %33 = vector.shape_cast %30 : vector<64x128xbf16> to vector<1x64x128xbf16>
    tpu.vector_store %arg8[%c0_19, %c0_20, %c0_21], %33 {strides = array<i32>} : memref<2x64x128xbf16, #tpu.memory_space<vmem>>, vector<1x64x128xbf16>,
    %34 = vector.extract_strided_slice %9 {offsets = [0, 128], sizes = [64, 128], strides = [1, 1]} : vector<64x256xbf16> to vector<64x128xbf16>
    %c1 = arith.constant 1 : index
    %c0_22 = arith.constant 0 : index
    %c0_23 = arith.constant 0 : index
    %35 = vector.load %arg4[%c1, %c0_22, %c0_23] : memref<2x128x128xbf16, #tpu.memory_space<vmem>>, vector<1x128x128xbf16>
    %36 = vector.shape_cast %35 : vector<1x128x128xbf16> to vector<128x128xbf16>
    %cst_24 = arith.constant dense<0.000000e+00> : vector<64x128xf32>
    %37 = tpu.matmul %34, %36, %cst_24 {dimension_numbers = #tpu.dot_dimension_numbers<[1], [0], [0], [1], [0, 0, 1, 1], [], []>} : vector<64x128xbf16>, vector<128x128xbf16>, vector<64x128xf32> -> vector<64x128xf32>
    %c1_25 = arith.constant 1 : index
    %c0_26 = arith.constant 0 : index
    %38 = vector.load %arg5[%c1_25, %c0_26] : memref<2x128xf32, #tpu.memory_space<vmem>>, vector<1x128xf32>
    %39 = vector.shape_cast %38 : vector<1x128xf32> to vector<128xf32>
    %40 = vector.shape_cast %39 : vector<128xf32> to vector<1x128xf32>
    %41 = vector.broadcast %40 : vector<1x128xf32> to vector<64x128xf32>
    %42 = arith.addf %37, %41 : vector<64x128xf32>
    %cst_27 = arith.constant 0.000000e+00 : f32
    %43 = vector.broadcast %cst_27 : f32 to vector<64x128xf32>
    %44 = arith.maximumf %42, %43 : vector<64x128xf32>
    %45 = arith.truncf %44 : vector<64x128xf32> to vector<64x128xbf16>
    %c1_28 = arith.constant 1 : index
    %c0_29 = arith.constant 0 : index
    %c0_30 = arith.constant 0 : index
    %46 = vector.load %arg6[%c1_28, %c0_29, %c0_30] : memref<2x128x128xbf16, #tpu.memory_space<vmem>>, vector<1x128x128xbf16>
    %47 = vector.shape_cast %46 : vector<1x128x128xbf16> to vector<128x128xbf16>
    %cst_31 = arith.constant dense<0.000000e+00> : vector<64x128xf32>
    %48 = tpu.matmul %45, %47, %cst_31 {dimension_numbers = #tpu.dot_dimension_numbers<[1], [0], [0], [1], [0, 0, 1, 1], [], []>} : vector<64x128xbf16>, vector<128x128xbf16>, vector<64x128xf32> -> vector<64x128xf32>
    %c1_32 = arith.constant 1 : index
    %c0_33 = arith.constant 0 : index
    %49 = vector.load %arg7[%c1_32, %c0_33] : memref<2x128xf32, #tpu.memory_space<vmem>>, vector<1x128xf32>
    %50 = vector.shape_cast %49 : vector<1x128xf32> to vector<128xf32>
    %51 = vector.shape_cast %50 : vector<128xf32> to vector<1x128xf32>
    %52 = vector.broadcast %51 : vector<1x128xf32> to vector<64x128xf32>
    %53 = arith.addf %48, %52 : vector<64x128xf32>
    %54 = arith.truncf %53 : vector<64x128xf32> to vector<64x128xbf16>
    %c1_34 = arith.constant 1 : index
    %c0_35 = arith.constant 0 : index
    %c0_36 = arith.constant 0 : index
    %55 = vector.load %arg8[%c1_34, %c0_35, %c0_36] : memref<2x64x128xbf16, #tpu.memory_space<vmem>>, vector<1x64x128xbf16>
    %56 = vector.shape_cast %55 : vector<1x64x128xbf16> to vector<64x128xbf16>
    %57 = vector.shape_cast %54 : vector<64x128xbf16> to vector<1x64x128xbf16>
    tpu.vector_store %arg8[%c1_34, %c0_35, %c0_36], %57 {strides = array<i32>} : memref<2x64x128xbf16, #tpu.memory_space<vmem>>, vector<1x64x128xbf16>,
    return
  }
  func.func @transform_0(%arg0: i32) -> (i32, i32) {
    %c0_i32 = arith.constant 0 : i32
    %c0_i32_0 = arith.constant 0 : i32
    return %arg0, %c0_i32 : i32, i32
  }
  func.func @transform_1(%arg0: i32) -> (i32, i32) {
    %c0_i32 = arith.constant 0 : i32
    %c0_i32_0 = arith.constant 0 : i32
    %c0_i32_1 = arith.constant 0 : i32
    return %c0_i32, %c0_i32_0 : i32, i32
  }
  func.func @transform_2(%arg0: i32) -> (i32, i32) {
    %c0_i32 = arith.constant 0 : i32
    %c0_i32_0 = arith.constant 0 : i32
    %c0_i32_1 = arith.constant 0 : i32
    return %c0_i32, %c0_i32_0 : i32, i32
  }
  func.func @transform_3(%arg0: i32) -> (i32, i32, i32) {
    %c0_i32 = arith.constant 0 : i32
    %c0_i32_0 = arith.constant 0 : i32
    %c0_i32_1 = arith.constant 0 : i32
    %c0_i32_2 = arith.constant 0 : i32
    return %c0_i32, %c0_i32_0, %c0_i32_1 : i32, i32, i32
  }
  func.func @transform_4(%arg0: i32) -> (i32, i32) {
    %c0_i32 = arith.constant 0 : i32
    %c0_i32_0 = arith.constant 0 : i32
    %c0_i32_1 = arith.constant 0 : i32
    return %c0_i32, %c0_i32_0 : i32, i32
  }
  func.func @transform_5(%arg0: i32) -> (i32, i32, i32) {
    %c0_i32 = arith.constant 0 : i32
    %c0_i32_0 = arith.constant 0 : i32
    %c0_i32_1 = arith.constant 0 : i32
    %c0_i32_2 = arith.constant 0 : i32
    return %c0_i32, %c0_i32_0, %c0_i32_1 : i32, i32, i32
  }
  func.func @transform_6(%arg0: i32) -> (i32, i32) {
    %c0_i32 = arith.constant 0 : i32
    %c0_i32_0 = arith.constant 0 : i32
    %c0_i32_1 = arith.constant 0 : i32
    return %c0_i32, %c0_i32_0 : i32, i32
  }
  func.func @transform_7(%arg0: i32) -> (i32, i32, i32) {
    %c0_i32 = arith.constant 0 : i32
    %c0_i32_0 = arith.constant 0 : i32
    %c0_i32_1 = arith.constant 0 : i32
    return %c0_i32, %arg0, %c0_i32_0 : i32, i32, i32
  }
}

</mosaic_0001>

<bundles_post_ra>
// kernel: fused_mlp.1
= control target key start
LH: loop header
LB: loop body
LE: loop exit
PB: predicated region body
PF: predicated region fallthrough
CT: control target
= control target key end

     0   :  { %12 = vsyncpa [#allocation3], 0  ;;  %s1560_s0 = inlined_call_operand.vmem [shape: f32[64,128], index: 0, kind: input, shape index: {}]   ;;  %s1561_s1 = inlined_call_operand.vmem [shape: bf16[128,256], index: 1, kind: input, shape index: {}]   ;;  %s1562_s2 = inlined_call_operand.vmem [shape: f32[1,256], index: 2, kind: input, shape index: {}]   ;;  %s1563_s3 = inlined_call_operand.vmem [shape: bf16[2,128,128], index: 3, kind: input, shape index: {}]   ;;  %s1564_s4 = inlined_call_operand.vmem [shape: f32[2,128], index: 4, kind: input, shape index: {}]   ;;  %s1565_s5 = inlined_call_operand.hbm [shape: bf16[2,128,128], index: 5, kind: input, shape index: {}]   ;;  %s1566_s6 = inlined_call_operand.vmem [shape: f32[2,128], index: 6, kind: input, shape index: {}]   ;;  %s1567_s7 = inlined_call_operand.hbm [shape: bf16[2,64,128], index: 7, kind: output, shape index: {}]  }
   0x1   :  { %13 = vsyncpa [#allocation4], 0  ;;  %s1334_s24 = smov [#allocation2]   ;;  %s1286_s28 = scalar_lea.hbm %s1565_s5, 2048 }
   0x2   :  { %s29_s25 = sshll.u32 %s1334_s24, 4  ;;  %p1287_p0 = scmp.ne.s32.totalorder %s1565_s5, %s1286_s28  ;;  %s30_s25 = int_to_ptr.vmem [resolvable:$true] %s29_s25 }
   0x3   :  { %p1290_p1 = scmp.lt.u32.totalorder %s1286_s28, %s1565_s5 }
   0x5   :  { %p1292_p2 = pnand %p1290_p1, %p1287_p0 }
   0x7   :  { %1295 = shalt.err (!%p1292_p2)
}
   0x8   :  { %s1296_s10 = scalar_lea.vmem %s30_s25, 2048  ;;  %p1301_p4 = scmp.lt.s32.totalorder %s30_s25, %s30_s25 }
   0x9   :  { %p1297_p3 = scmp.ne.s32.totalorder %s30_s25, %s1296_s10  ;;  %p1302_p5 = scmp.lt.s32.totalorder %s1296_s10, %s1296_s10 }
   0xb   :  { %p1303_p6 = por %p1302_p5, %p1301_p4 }
   0xd   :  { %p1304_p7 = pnand %p1303_p6, %p1297_p3 }
   0xf   :  { %1307 = shalt.err (!%p1304_p7)
}
  0x10   :  { %s1335_s11 = smov 64   ;;  %s1336_s12 = smov 4  }
  0x11   :  { %35 = dma.hbm_to_vmem [thread:$0]  %s1565_s5, 2048, %s30_s25, [#allocation3], %s1335_s11, %s1335_s11, %s1336_s12  }
  0x12   :  { %1330 = dma.done.wait [#allocation3], 2048  }
  0x13   :  { %1331 = vsyncadd [#allocation3], 4294965248  ;;  %v1337_v0 = vmov 0   ;;  %v1230_v1 = vld [vmem:[%s1561_s1 + $0x4] ss:$8 sps:$4 sm:$0xff]   ;;  %v1256_v15 = vld [vmem:[%s1563_s3 + $0x10] sm:$0xff]   ;;  %v72_v44 = vlaneseq }
  0x14   :  { %194 = vmatprep.mubr.bf16.mxu0 %v1337_v0  ;;  %v1232_v2 = vld [vmem:[%s1561_s1] ss:$8 sps:$4 sm:$0xff]   ;;  %162 = vmatprep.subr.bf16.mxu0 %v1230_v1  ;;  %v1233_v3 = vld [vmem:[%s1561_s1 + $0x14] ss:$8 sps:$4 sm:$0xff]   ;;  %v1235_v4 = vld [vmem:[%s1561_s1 + $0x10] ss:$8 sps:$4 sm:$0xff]  }
  0x15   :  { %163 = vmatpush1.bf16.msra.mxu0 %v1232_v2  ;;  %v1236_v5 = vld [vmem:[%s1561_s1 + $0x24] ss:$8 sps:$4 sm:$0xff]   ;;  %v1238_v6 = vld [vmem:[%s1561_s1 + $0x20] ss:$8 sps:$4 sm:$0xff]   ;;  %v1239_v7 = vld [vmem:[%s1561_s1 + $0x34] ss:$8 sps:$4 sm:$0xff]  }
  0x16   :  { %164 = vmatprep.subr.bf16.mxu0 %v1233_v3  ;;  %v1241_v8 = vld [vmem:[%s1561_s1 + $0x30] ss:$8 sps:$4 sm:$0xff]   ;;  %v1242_v9 = vld [vmem:[%s1561_s1 + $0x44] ss:$8 sps:$4 sm:$0xff]   ;;  %v1244_v10 = vld [vmem:[%s1561_s1 + $0x40] ss:$8 sps:$4 sm:$0xff]  }
  0x17   :  { %v1254_v11 = vld [vmem:[%s1563_s3] sm:$0xff]   ;;  %v1255_v12 = vld [vmem:[%s1563_s3 + $0x8] sm:$0xff]   ;;  %v1245_v13 = vld [vmem:[%s1561_s1 + $0x54] ss:$8 sps:$4 sm:$0xff]   ;;  %v73_v45 = vshrl.u32 %v72_v44, 7  ;;  %s1338_s8 = smov [#allocation5]  }
  0x18   :  { %1113 = vmatprep.subr.bf16.mxu1 %v1254_v11  ;;  %v1247_v14 = vld [vmem:[%s1561_s1 + $0x50] ss:$8 sps:$4 sm:$0xff]   ;;  %v1248_v16 = vld [vmem:[%s1561_s1 + $0x64] ss:$8 sps:$4 sm:$0xff]   ;;  %v1250_v18 = vld [vmem:[%s1561_s1 + $0x60] ss:$8 sps:$4 sm:$0xff]  }
  0x19   :  { %165 = vmatpush1.bf16.msra.mxu0 %v1235_v4  ;;  %1114 = vmatpush3.bf16.msra.mxu1 %v1254_v11  ;;  %v1257_v17 = vld [vmem:[%s1563_s3 + $0x18] sm:$0xff]   ;;  %v42_v21 = vld [vmem:[%s1560_s0] sm:$0xff]  ;;  %v43_v22 = vld [vmem:[%s1560_s0 + $0x8] sm:$0xff]  ;;  %v74_v46 = vsub.s32 0, %v73_v45  ;;  %v78_v48 = vsub.s32 1, %v73_v45  ;;  %s907_s9 = sshll.u32 %s1338_s8, 4  ;;  %s908_s9 = int_to_ptr.vmem [resolvable:$true] %s907_s9 }
  0x1a   :  { %166 = vmatprep.subr.bf16.mxu0 %v1236_v5  ;;  %1115 = vmatprep.subr.bf16.mxu1 %v1255_v12  ;;  %v1251_v19 = vld [vmem:[%s1561_s1 + $0x74] ss:$8 sps:$4 sm:$0xff]   ;;  %v1253_v20 = vld [vmem:[%s1561_s1 + $0x70] ss:$8 sps:$4 sm:$0xff]   ;;  %v50_v23 = vpack.c.bf16 %v43_v22, %v42_v21  ;;  %v46_v27 = vld [vmem:[%s1560_s0 + $0x20] sm:$0xff]  ;;  %p1313_p9 = scmp.lt.s32.totalorder %s908_s9, %s908_s9 }
  0x1b   :  { %v44_v24 = vld [vmem:[%s1560_s0 + $0x10] sm:$0xff]  ;;  %v45_v25 = vld [vmem:[%s1560_s0 + $0x18] sm:$0xff]  ;;  %v47_v28 = vld [vmem:[%s1560_s0 + $0x28] sm:$0xff] }
  0x1c   :  { %v51_v26 = vpack.c.bf16 %v45_v25, %v44_v24  ;;  %v52_v29 = vpack.c.bf16 %v47_v28, %v46_v27  ;;  %v48_v30 = vld [vmem:[%s1560_s0 + $0x30] sm:$0xff]  ;;  %v49_v31 = vld [vmem:[%s1560_s0 + $0x38] sm:$0xff]  ;;  %v1258_v33 = vld [vmem:[%s1563_s3 + $0x20] sm:$0xff]  }
  0x1d   :  { %167 = vmatpush1.bf16.msra.mxu0 %v1238_v6  ;;  %1116 = vmatpush3.bf16.msra.mxu1 %v1255_v12  ;;  %v53_v32 = vpack.c.bf16 %v49_v31, %v48_v30  ;;  %v1259_v34 = vld [vmem:[%s1563_s3 + $0x28] sm:$0xff]   ;;  %v1260_v35 = vld [vmem:[%s1563_s3 + $0x30] sm:$0xff]   ;;  %v1261_v36 = vld [vmem:[%s1563_s3 + $0x38] sm:$0xff]  }
  0x1e   :  { %168 = vmatprep.subr.bf16.mxu0 %v1239_v7  ;;  %1117 = vmatprep.subr.bf16.mxu1 %v1256_v15  ;;  %v1262_v37 = vld [vmem:[%s1563_s3 + $0x40] sm:$0xff]   ;;  %v1271_v39 = vld [vmem:[#allocation2 + $0x8] sm:$0xff]   ;;  %v1272_v40 = vld [vmem:[#allocation2 + $0x10] sm:$0xff]  }
  0x1f   :  { %v1270_v38 = vld [vmem:[#allocation2] sm:$0xff]   ;;  %v1273_v41 = vld [vmem:[#allocation2 + $0x18] sm:$0xff]   ;;  %v1275_v43 = vld [vmem:[#allocation2 + $0x28] sm:$0xff]  }
  0x20   :  { %v1274_v42 = vld [vmem:[#allocation2 + $0x20] sm:$0xff]   ;;  %v1264_v24 = vld [vmem:[%s1563_s3 + $0x50] sm:$0xff]   ;;  %v1265_v30 = vld [vmem:[%s1563_s3 + $0x58] sm:$0xff]  }
  0x21   :  { %169 = vmatpush1.bf16.msra.mxu0 %v1241_v8  ;;  %1118 = vmatpush3.bf16.msra.mxu1 %v1256_v15  ;;  %v70_v47 = vld [vmem:[%s1562_s2] sm:$0x3] }
  0x22   :  { %170 = vmatprep.subr.bf16.mxu0 %v1242_v9  ;;  %1119 = vmatprep.subr.bf16.mxu1 %v1257_v17  ;;  %v75_v49 = vrot.slane %v70_v47, %v74_v46  ;;  %v1496_v50 = vrot.slane %v70_v47, %v78_v48  ;;  %v1267_v46 = vld [vmem:[%s1563_s3 + $0x68] sm:$0xff]   ;;  %v1268_v48 = vld [vmem:[%s1563_s3 + $0x70] sm:$0xff]  }
  0x25   :  { %171 = vmatpush1.bf16.msra.mxu0 %v1244_v10  ;;  %1120 = vmatpush3.bf16.msra.mxu1 %v1257_v17 }
  0x26   :  { %172 = vmatprep.subr.bf16.mxu0 %v1245_v13  ;;  %1121 = vmatprep.subr.bf16.mxu1 %v1258_v33 }
  0x29   :  { %173 = vmatpush1.bf16.msra.mxu0 %v1247_v14  ;;  %1122 = vmatpush3.bf16.msra.mxu1 %v1258_v33  ;;  %v1263_v14 = vld [vmem:[%s1563_s3 + $0x48] sm:$0xff]  }
  0x2a   :  { %174 = vmatprep.subr.bf16.mxu0 %v1248_v16  ;;  %1123 = vmatprep.subr.bf16.mxu1 %v1259_v34 }
  0x2d   :  { %175 = vmatpush1.bf16.msra.mxu0 %v1250_v18  ;;  %1124 = vmatpush3.bf16.msra.mxu1 %v1259_v34 }
  0x2e   :  { %176 = vmatprep.subr.bf16.mxu0 %v1251_v19  ;;  %1125 = vmatprep.subr.bf16.mxu1 %v1260_v35 }
  0x31   :  { %177 = vmatpush1.bf16.msra.mxu0 %v1253_v20  ;;  %1126 = vmatpush3.bf16.msra.mxu1 %v1260_v35 }
  0x32   :  { %1127 = vmatprep.subr.bf16.mxu1 %v1261_v36  ;;  %1137 = vmatprep.subr.bf16.mxu0 %v1270_v38 }
  0x34   :  { %195 = vmatmul.mubr.bf16.vlgmr.msra.gmra.mrb[0].mxu0 %v50_v23 }
  0x35   :  { %204 = vmatprep.mubr.bf16.mxu0 %v1337_v0  ;;  %1128 = vmatpush3.bf16.msra.mxu1 %v1261_v36 }
  0x36   :  { %1161 = vmatprep.subr.bf16.mxu1 %v1262_v37  ;;  %1138 = vmatpush3.bf16.msra.mxu0 %v1270_v38 }
  0x37   :  { %1139 = vmatprep.subr.bf16.mxu0 %v1271_v39 }
  0x3a   :  { %1140 = vmatpush3.bf16.msra.mxu0 %v1271_v39 }
  0x3b   :  { %1141 = vmatprep.subr.bf16.mxu0 %v1272_v40 }
  0x3c   :  { %205 = vmatmul.mubr.bf16.gmra.mrb[4].mxu0 %v51_v26 }
  0x3d   :  { %214 = vmatprep.mubr.bf16.mxu0 %v1337_v0 }
  0x3e   :  { %1142 = vmatpush3.bf16.msra.mxu0 %v1272_v40  ;;  %v1266_v40 = vld [vmem:[%s1563_s3 + $0x60] sm:$0xff]  }
  0x3f   :  { %1143 = vmatprep.subr.bf16.mxu0 %v1273_v41 }
  0x42   :  { %1144 = vmatpush3.bf16.msra.mxu0 %v1273_v41 }
  0x43   :  { %1145 = vmatprep.subr.bf16.mxu0 %v1274_v42 }
  0x44   :  { %215 = vmatmul.mubr.bf16.gmra.mrb[8].mxu0 %v52_v29 }
  0x45   :  { %224 = vmatprep.mubr.bf16.mxu0 %v1337_v0 }
  0x46   :  { %1146 = vmatpush3.bf16.msra.mxu0 %v1274_v42 }
  0x47   :  { %1147 = vmatprep.subr.bf16.mxu0 %v1275_v43 }
  0x4a   :  { %1148 = vmatpush3.bf16.msra.mxu0 %v1275_v43 }
  0x4c   :  { %225 = vmatmul.mubr.bf16.gmra.mrb[12].mxu0 %v53_v32 }
 0x107   :  { %v196_v51 = vpop.f32.mrb[0].mxu0 }
 0x108   :  { %v197_v52 = vadd.f32 %v196_v51, %v75_v49  ;;  %v198_v53 = vpop.f32.mrb[1].mxu0  ;;  %v1277_v51 = vld [vmem:[#allocation2 + $0x38] sm:$0xff]  }
 0x109   :  { %v199_v54 = vadd.f32 %v198_v53, %v1496_v50  ;;  %v200_v55 = vpop.f32.mrb[2].mxu0  ;;  %v1279_v53 = vld [vmem:[#allocation2 + $0x48] sm:$0xff]  }
 0x10a   :  { %v201_v56 = vadd.f32 %v200_v55, %v75_v49  ;;  %v202_v57 = vpop.f32.mrb[3].mxu0  ;;  %v235_v59 = vmax.f32 %v197_v52, 0.0  ;;  %v1278_v52 = vld [vmem:[#allocation2 + $0x40] sm:$0xff]   ;;  %v1281_v55 = vld [vmem:[#allocation2 + $0x58] sm:$0xff]  }
 0x10b   :  { %v203_v58 = vadd.f32 %v202_v57, %v1496_v50  ;;  %v236_v61 = vmax.f32 %v199_v54, 0.0  ;;  %v1280_v54 = vld [vmem:[#allocation2 + $0x50] sm:$0xff]   ;;  %v1283_v57 = vld [vmem:[#allocation2 + $0x68] sm:$0xff]  }
 0x10c   :  { %v237_v60 = vmax.f32 %v201_v56, 0.0  ;;  %v1282_v56 = vld [vmem:[#allocation2 + $0x60] sm:$0xff]  }
 0x10d   :  { %v238_v62 = vmax.f32 %v203_v58, 0.0  ;;  %v1284_v58 = vld [vmem:[#allocation2 + $0x70] sm:$0xff]  }
 0x10e   :  { %v251_v63 = vpack.c.bf16 %v237_v60, %v235_v59  ;;  %v1527_v59 = vld [vmem:[#allocation2 + $0x78] sm:$0xff]   ;;  %v935_v60 = vld [vmem:[%s1564_s4] ss:$0 sm:$0xff] }
 0x10f   :  { %v252_v0 = vpack.c.bf16 %v238_v62, %v236_v61  ;;  %v206_v1 = vpop.f32.mrb[4].mxu0 }
 0x110   :  { %v207_v2 = vadd.f32 %v206_v1, %v75_v49  ;;  %v208_v3 = vpop.f32.mrb[5].mxu0  ;;  %1129 = vmatprep.mubr.bf16.mxu1 %v251_v63 }
 0x111   :  { %v209_v4 = vadd.f32 %v208_v3, %v1496_v50  ;;  %v210_v5 = vpop.f32.mrb[6].mxu0 }
 0x112   :  { %v211_v6 = vadd.f32 %v210_v5, %v75_v49  ;;  %v212_v7 = vpop.f32.mrb[7].mxu0  ;;  %v239_v9 = vmax.f32 %v207_v2, 0.0 }
 0x113   :  { %v213_v8 = vadd.f32 %v212_v7, %v1496_v50  ;;  %v240_v11 = vmax.f32 %v209_v4, 0.0 }
 0x114   :  { %v241_v10 = vmax.f32 %v211_v6, 0.0 }
 0x115   :  { %v242_v12 = vmax.f32 %v213_v8, 0.0 }
 0x116   :  { %v253_v13 = vpack.c.bf16 %v241_v10, %v239_v9 }
 0x117   :  { %v254_v15 = vpack.c.bf16 %v242_v12, %v240_v11  ;;  %v216_v16 = vpop.f32.mrb[8].mxu0 }
 0x118   :  { %1130 = vmatmul.mubr.bf16.vlgmr.msra.gmra.mrb[0].mxu1 %v253_v13  ;;  %v217_v17 = vadd.f32 %v216_v16, %v75_v49  ;;  %v218_v18 = vpop.f32.mrb[9].mxu0 }
 0x119   :  { %1162 = vmatpush3.bf16.msra.mxu1 %v1262_v37  ;;  %v219_v19 = vadd.f32 %v218_v18, %v1496_v50  ;;  %v220_v20 = vpop.f32.mrb[10].mxu0 }
 0x11a   :  { %v243_v21 = vmax.f32 %v217_v17, 0.0  ;;  %1163 = vmatprep.subr.bf16.mxu1 %v1263_v14  ;;  %v221_v22 = vadd.f32 %v220_v20, %v75_v49  ;;  %v222_v23 = vpop.f32.mrb[11].mxu0 }
 0x11b   :  { %v244_v25 = vmax.f32 %v219_v19, 0.0  ;;  %v223_v26 = vadd.f32 %v222_v23, %v1496_v50 }
 0x11c   :  { %v245_v27 = vmax.f32 %v221_v22, 0.0 }
 0x11d   :  { %1164 = vmatpush3.bf16.msra.mxu1 %v1263_v14  ;;  %v246_v28 = vmax.f32 %v223_v26, 0.0 }
 0x11e   :  { %v255_v29 = vpack.c.bf16 %v245_v27, %v243_v21  ;;  %1165 = vmatprep.subr.bf16.mxu1 %v1264_v24 }
 0x11f   :  { %v256_v31 = vpack.c.bf16 %v246_v28, %v244_v25  ;;  %v226_v32 = vpop.f32.mrb[12].mxu0  ;;  %v977_v25 = vld [vmem:[%s1564_s4 + $0x1] ss:$0 sm:$0xff] }
 0x120   :  { %v227_v33 = vadd.f32 %v226_v32, %v75_v49  ;;  %v228_v34 = vpop.f32.mrb[13].mxu0  ;;  %1133 = vmatprep.mubr.bf16.mxu1 %v255_v29 }
 0x121   :  { %v229_v35 = vadd.f32 %v228_v34, %v1496_v50  ;;  %1166 = vmatpush3.bf16.msra.mxu1 %v1264_v24  ;;  %v230_v36 = vpop.f32.mrb[14].mxu0 }
 0x122   :  { %v247_v37 = vmax.f32 %v227_v33, 0.0  ;;  %v231_v38 = vadd.f32 %v230_v36, %v75_v49  ;;  %1167 = vmatprep.subr.bf16.mxu1 %v1265_v30  ;;  %v232_v39 = vpop.f32.mrb[15].mxu0  ;;  %v1269_v49 = vld [vmem:[%s1563_s3 + $0x78] sm:$0xff]  }
 0x123   :  { %v248_v41 = vmax.f32 %v229_v35, 0.0  ;;  %v233_v42 = vadd.f32 %v232_v39, %v1496_v50  ;;  %v1276_v50 = vld [vmem:[#allocation2 + $0x30] sm:$0xff]  }
 0x124   :  { %v249_v43 = vmax.f32 %v231_v38, 0.0  ;;  %1149 = vmatprep.subr.bf16.mxu0 %v1276_v50 }
 0x125   :  { %1168 = vmatpush3.bf16.msra.mxu1 %v1265_v30  ;;  %v250_v44 = vmax.f32 %v233_v42, 0.0  ;;  %1150 = vmatpush3.bf16.msra.mxu0 %v1276_v50 }
 0x126   :  { %v257_v45 = vpack.c.bf16 %v249_v43, %v247_v37  ;;  %1169 = vmatprep.subr.bf16.mxu1 %v1266_v40  ;;  %1151 = vmatprep.subr.bf16.mxu0 %v1277_v51 }
 0x127   :  { %v258_v47 = vpack.c.bf16 %v250_v44, %v248_v41 }
 0x128   :  { %1134 = vmatmul.mubr.bf16.gmra.mrb[4].mxu1 %v257_v45 }
 0x129   :  { %1170 = vmatpush3.bf16.msra.mxu1 %v1266_v40  ;;  %1177 = vmatprep.mubr.bf16.mxu1 %v252_v0 }
 0x12a   :  { %1171 = vmatprep.subr.bf16.mxu1 %v1267_v46  ;;  %1152 = vmatpush3.bf16.msra.mxu0 %v1277_v51 }
 0x12b   :  { %1185 = vmatprep.subr.bf16.mxu0 %v1278_v52 }
 0x12d   :  { %1172 = vmatpush3.bf16.msra.mxu1 %v1267_v46 }
 0x12e   :  { %1173 = vmatprep.subr.bf16.mxu1 %v1268_v48 }
 0x131   :  { %1174 = vmatpush3.bf16.msra.mxu1 %v1268_v48 }
 0x132   :  { %1175 = vmatprep.subr.bf16.mxu1 %v1269_v49 }
 0x135   :  { %1176 = vmatpush3.bf16.msra.mxu1 %v1269_v49 }
 0x136   :  { %1209 = vmatprep.subr.bf16.mxu1 %v1278_v52 }
 0x138   :  { %1178 = vmatmul.mubr.bf16.vlgmr.msra.gmra.mrb[8].mxu1 %v254_v15 }
 0x139   :  { %1181 = vmatprep.mubr.bf16.mxu1 %v256_v31  ;;  %1217 = vmatpush3.bf16.msra.mxu1 %v1278_v52 }
 0x13a   :  { %1210 = vmatprep.subr.bf16.mxu1 %v1279_v53 }
 0x13d   :  { %1218 = vmatpush3.bf16.msra.mxu1 %v1279_v53 }
 0x13e   :  { %1211 = vmatprep.subr.bf16.mxu1 %v1280_v54 }
 0x140   :  { %1182 = vmatmul.mubr.bf16.gmra.mrb[12].mxu1 %v258_v47 }
 0x141   :  { %1219 = vmatpush3.bf16.msra.mxu1 %v1280_v54 }
 0x142   :  { %1212 = vmatprep.subr.bf16.mxu1 %v1281_v55 }
 0x145   :  { %1220 = vmatpush3.bf16.msra.mxu1 %v1281_v55 }
 0x146   :  { %1213 = vmatprep.subr.bf16.mxu1 %v1282_v56 }
 0x149   :  { %1221 = vmatpush3.bf16.msra.mxu1 %v1282_v56 }
 0x14a   :  { %1214 = vmatprep.subr.bf16.mxu1 %v1283_v57 }
 0x14d   :  { %1222 = vmatpush3.bf16.msra.mxu1 %v1283_v57 }
 0x14e   :  { %1215 = vmatprep.subr.bf16.mxu1 %v1284_v58 }
 0x151   :  { %1223 = vmatpush3.bf16.msra.mxu1 %v1284_v58 }
 0x152   :  { %1216 = vmatprep.subr.bf16.mxu1 %v1527_v59 }
 0x155   :  { %1224 = vmatpush3.bf16.msra.mxu1 %v1527_v59 }
 0x1eb   :  { %v1131_v61 = vpop.f32.mrb[0].mxu1 }
 0x1ec   :  { %v371_v62 = vadd.f32 %v1131_v61, %v935_v60  ;;  %v362_v63 = vpop.f32.mrb[1].mxu1 }
 0x1ed   :  { %v363_v0 = vadd.f32 %v935_v60, %v362_v63  ;;  %v1132_v1 = vpop.f32.mrb[2].mxu1 }
 0x1ee   :  { %v374_v2 = vadd.f32 %v1132_v1, %v935_v60  ;;  %v365_v3 = vpop.f32.mrb[3].mxu1  ;;  %v395_v5 = vmax.f32 %v371_v62, 0.0 }
 0x1ef   :  { %v366_v4 = vadd.f32 %v935_v60, %v365_v3  ;;  %v393_v7 = vmax.f32 %v363_v0, 0.0 }
 0x1f0   :  { %v396_v6 = vmax.f32 %v374_v2, 0.0 }
 0x1f1   :  { %v394_v8 = vmax.f32 %v366_v4, 0.0 }
 0x1f2   :  { %v402_v9 = vpack.c.bf16 %v396_v6, %v395_v5 }
 0x1f3   :  { %v401_v10 = vpack.c.bf16 %v394_v8, %v393_v7 }
 0x1f5   :  { %1153 = vmatprep.mubr.bf16.mxu0 %v401_v10 }
 0x1f6   :  { %1154 = vmatmul.mubr.bf16.vlgmr.msra.gmra.mrb[16].mxu0 %v402_v9 }
 0x1f7   :  { %1186 = vmatpush3.bf16.msra.mxu0 %v1278_v52 }
 0x1f8   :  { %1187 = vmatprep.subr.bf16.mxu0 %v1279_v53 }
 0x1fb   :  { %1188 = vmatpush3.bf16.msra.mxu0 %v1279_v53  ;;  %v1135_v11 = vpop.f32.mrb[4].mxu1 }
 0x1fc   :  { %v387_v12 = vadd.f32 %v1135_v11, %v935_v60  ;;  %v378_v13 = vpop.f32.mrb[5].mxu1  ;;  %1189 = vmatprep.subr.bf16.mxu0 %v1280_v54 }
 0x1fd   :  { %v379_v14 = vadd.f32 %v935_v60, %v378_v13  ;;  %v1136_v15 = vpop.f32.mrb[6].mxu1 }
 0x1fe   :  { %v399_v16 = vmax.f32 %v387_v12, 0.0  ;;  %v390_v17 = vadd.f32 %v1136_v15, %v935_v60  ;;  %v381_v18 = vpop.f32.mrb[7].mxu1  ;;  %v986_v12 = vld [vmem:[%s1566_s6 + $0x1] ss:$0 sm:$0xff] }
 0x1ff   :  { %v397_v19 = vmax.f32 %v379_v14, 0.0  ;;  %v382_v20 = vadd.f32 %v935_v60, %v381_v18  ;;  %1190 = vmatpush3.bf16.msra.mxu0 %v1280_v54 }
 0x200   :  { %v400_v21 = vmax.f32 %v390_v17, 0.0  ;;  %1191 = vmatprep.subr.bf16.mxu0 %v1281_v55 }
 0x201   :  { %v398_v22 = vmax.f32 %v382_v20, 0.0 }
 0x202   :  { %v404_v23 = vpack.c.bf16 %v400_v21, %v399_v16 }
 0x203   :  { %v403_v24 = vpack.c.bf16 %v398_v22, %v397_v19  ;;  %1192 = vmatpush3.bf16.msra.mxu0 %v1281_v55  ;;  %v944_v55 = vld [vmem:[%s1566_s6] ss:$0 sm:$0xff]  ;;  %s1308_s6 = scalar_lea.vmem %s908_s9, 1024 }
 0x204   :  { %1193 = vmatprep.subr.bf16.mxu0 %v1282_v56  ;;  %p1309_p8 = scmp.ne.s32.totalorder %s908_s9, %s1308_s6  ;;  %p1314_p10 = scmp.lt.s32.totalorder %s1308_s6, %s1308_s6 }
 0x205   :  { %1157 = vmatprep.mubr.bf16.mxu0 %v403_v24 }
 0x206   :  { %1158 = vmatmul.mubr.bf16.gmra.mrb[20].mxu0 %v404_v23  ;;  %p1315_p11 = por %p1314_p10, %p1313_p9 }
 0x207   :  { %1194 = vmatpush3.bf16.msra.mxu0 %v1282_v56 }
 0x208   :  { %1195 = vmatprep.subr.bf16.mxu0 %v1283_v57  ;;  %p1316_p12 = pnand %p1315_p11, %p1309_p8 }
 0x20b   :  { %v1179_v26 = vpop.f32.mrb[8].mxu1  ;;  %1196 = vmatpush3.bf16.msra.mxu0 %v1283_v57 }
 0x20c   :  { %v692_v27 = vadd.f32 %v1179_v26, %v977_v25  ;;  %v683_v28 = vpop.f32.mrb[9].mxu1  ;;  %1197 = vmatprep.subr.bf16.mxu0 %v1284_v58 }
 0x20d   :  { %v684_v29 = vadd.f32 %v977_v25, %v683_v28  ;;  %v1180_v30 = vpop.f32.mrb[10].mxu1 }
 0x20e   :  { %v695_v31 = vadd.f32 %v1180_v30, %v977_v25  ;;  %v686_v32 = vpop.f32.mrb[11].mxu1  ;;  %v716_v34 = vmax.f32 %v692_v27, 0.0 }
 0x20f   :  { %v687_v33 = vadd.f32 %v977_v25, %v686_v32  ;;  %1198 = vmatpush3.bf16.msra.mxu0 %v1284_v58  ;;  %v714_v36 = vmax.f32 %v684_v29, 0.0 }
 0x210   :  { %v717_v35 = vmax.f32 %v695_v31, 0.0  ;;  %1199 = vmatprep.subr.bf16.mxu0 %v1527_v59 }
 0x211   :  { %v715_v37 = vmax.f32 %v687_v33, 0.0 }
 0x212   :  { %v723_v38 = vpack.c.bf16 %v717_v35, %v716_v34 }
 0x213   :  { %v722_v39 = vpack.c.bf16 %v715_v37, %v714_v36  ;;  %v1183_v40 = vpop.f32.mrb[12].mxu1  ;;  %1200 = vmatpush3.bf16.msra.mxu0 %v1527_v59 }
 0x214   :  { %v708_v41 = vadd.f32 %v1183_v40, %v977_v25  ;;  %v699_v42 = vpop.f32.mrb[13].mxu1 }
 0x215   :  { %v700_v43 = vadd.f32 %v977_v25, %v699_v42  ;;  %v1184_v44 = vpop.f32.mrb[14].mxu1  ;;  %1201 = vmatprep.mubr.bf16.mxu0 %v722_v39 }
 0x216   :  { %v711_v45 = vadd.f32 %v1184_v44, %v977_v25  ;;  %v702_v46 = vpop.f32.mrb[15].mxu1  ;;  %1202 = vmatmul.mubr.bf16.vlgmr.msra.gmra.mrb[24].mxu0 %v723_v38  ;;  %v720_v48 = vmax.f32 %v708_v41, 0.0 }
 0x217   :  { %v703_v47 = vadd.f32 %v977_v25, %v702_v46  ;;  %v718_v50 = vmax.f32 %v700_v43, 0.0 }
 0x218   :  { %v721_v49 = vmax.f32 %v711_v45, 0.0 }
 0x219   :  { %v719_v51 = vmax.f32 %v703_v47, 0.0 }
 0x21a   :  { %v725_v52 = vpack.c.bf16 %v721_v49, %v720_v48 }
 0x21b   :  { %v724_v53 = vpack.c.bf16 %v719_v51, %v718_v50 }
 0x21d   :  { %1205 = vmatprep.mubr.bf16.mxu1 %v724_v53 }
 0x21e   :  { %1206 = vmatmul.mubr.bf16.vlgmr.msra.gmra.mrb[16].mxu1 %v725_v52 }
 0x2c9   :  { %v1155_v54 = vpop.f32.mrb[16].mxu0 }
 0x2ca   :  { %v508_v56 = vpop.f32.mrb[17].mxu0  ;;  %v517_v58 = vadd.f32 %v1155_v54, %v944_v55 }
 0x2cb   :  { %v1156_v57 = vpop.f32.mrb[18].mxu0  ;;  %v509_v61 = vadd.f32 %v944_v55, %v508_v56 }
 0x2cc   :  { %v520_v59 = vadd.f32 %v1156_v57, %v944_v55  ;;  %v511_v60 = vpop.f32.mrb[19].mxu0 }
 0x2cd   :  { %v512_v62 = vadd.f32 %v944_v55, %v511_v60 }
 0x2ce   :  { %v1027_v63 = vpack.c.bf16 %v520_v59, %v517_v58 }
 0x2cf   :  { %v1022_v0 = vpack.c.bf16 %v512_v62, %v509_v61 }
 0x2d0   :  { %1059 = vst [vmem:[#allocation5 + $0x8] sm:$0xff] %v1027_v63  }
 0x2d1   :  { %1023 = vst [vmem:[#allocation5] sm:$0xff] %v1022_v0  }
 0x2d9   :  { %v1159_v1 = vpop.f32.mrb[20].mxu0 }
 0x2da   :  { %v533_v2 = vadd.f32 %v1159_v1, %v944_v55  ;;  %v524_v3 = vpop.f32.mrb[21].mxu0 }
 0x2db   :  { %v1160_v4 = vpop.f32.mrb[22].mxu0  ;;  %v525_v7 = vadd.f32 %v944_v55, %v524_v3 }
 0x2dc   :  { %v536_v5 = vadd.f32 %v1160_v4, %v944_v55  ;;  %v527_v6 = vpop.f32.mrb[23].mxu0 }
 0x2dd   :  { %v528_v8 = vadd.f32 %v944_v55, %v527_v6 }
 0x2de   :  { %v1037_v9 = vpack.c.bf16 %v536_v5, %v533_v2 }
 0x2df   :  { %v1032_v10 = vpack.c.bf16 %v528_v8, %v525_v7 }
 0x2e0   :  { %1061 = vst [vmem:[#allocation5 + $0x18] sm:$0xff] %v1037_v9  }
 0x2e1   :  { %1060 = vst [vmem:[#allocation5 + $0x10] sm:$0xff] %v1032_v10  }
 0x2e9   :  { %v1203_v11 = vpop.f32.mrb[24].mxu0 }
 0x2ea   :  { %v830_v13 = vpop.f32.mrb[25].mxu0  ;;  %v839_v15 = vadd.f32 %v1203_v11, %v986_v12 }
 0x2eb   :  { %v1204_v14 = vpop.f32.mrb[26].mxu0  ;;  %v831_v18 = vadd.f32 %v986_v12, %v830_v13 }
 0x2ec   :  { %v842_v16 = vadd.f32 %v1204_v14, %v986_v12  ;;  %v833_v17 = vpop.f32.mrb[27].mxu0 }
 0x2ed   :  { %v834_v19 = vadd.f32 %v986_v12, %v833_v17 }
 0x2ee   :  { %v1047_v20 = vpack.c.bf16 %v842_v16, %v839_v15 }
 0x2ef   :  { %v1042_v21 = vpack.c.bf16 %v834_v19, %v831_v18 }
 0x2f0   :  { %1062 = vst [vmem:[#allocation5 + $0x28] sm:$0xff] %v1047_v20  }
 0x2f1   :  { %1043 = vst [vmem:[#allocation5 + $0x20] sm:$0xff] %v1042_v21   ;;  %v1207_v22 = vpop.f32.mrb[16].mxu1 }
 0x2f2   :  { %v846_v23 = vpop.f32.mrb[17].mxu1  ;;  %v855_v25 = vadd.f32 %v1207_v22, %v986_v12 }
 0x2f3   :  { %v1208_v24 = vpop.f32.mrb[18].mxu1  ;;  %v847_v28 = vadd.f32 %v986_v12, %v846_v23 }
 0x2f4   :  { %v858_v26 = vadd.f32 %v1208_v24, %v986_v12  ;;  %v849_v27 = vpop.f32.mrb[19].mxu1 }
 0x2f5   :  { %v850_v29 = vadd.f32 %v986_v12, %v849_v27 }
 0x2f6   :  { %v1057_v30 = vpack.c.bf16 %v858_v26, %v855_v25 }
 0x2f7   :  { %v1052_v31 = vpack.c.bf16 %v850_v29, %v847_v28 }
 0x2f8   :  { %1064 = vst [vmem:[#allocation5 + $0x38] sm:$0xff] %v1057_v30  }
 0x2f9   :  { %1063 = vst [vmem:[#allocation5 + $0x30] sm:$0xff] %v1052_v31  }
 0x2fa   :  { %1319 = shalt.err (!%p1316_p12)
}
 0x2fb   :  { %s1320_s14 = scalar_lea.hbm %s1567_s7, 1024 }
 0x2fc   :  { %p1321_p13 = scmp.ne.s32.totalorder %s1567_s7, %s1320_s14  ;;  %p1324_p0 = scmp.lt.u32.totalorder %s1320_s14, %s1567_s7 }
 0x2fe   :  { %p1326_p1 = pnand %p1324_p0, %p1321_p13 }
 0x300   :  { %1329 = shalt.err (!%p1326_p1)
}
 0x301   :  { %913 = dma.vmem_to_hbm [thread:$0]  %s908_s9, 1024, %s1567_s7, [#allocation4], %s1335_s11, %s1335_s11, %s1336_s12  }
 0x302   :  { %1332 = dma.done.wait [#allocation4], 1024  }
 0x303   :  { %1333 = vsyncadd [#allocation4], 4294966272 }
 0x304   :  { %917 = vsyncpa [#allocation3], 1 }
 0x305   :  { %918 = vsyncpa [#allocation4], 1 }

</bundles_post_ra>
